<compile_context>
chip_gen: v5e
topology: v5e:2x2
jax: 0.10.0
libtpu: 0.0.40
codegen_flags: <defaults>
</compile_context>

<pallas_src>
import functools

import jax
import jax.numpy as jnp
from jax.experimental import pallas as pl
from jax.experimental.pallas import tpu as pltpu

LANE = 128
NEG = -1e30  # fill value for padded vocab lanes (masked out of the softmax)


def bigram_kernel(idx_smem, tgt_ref, table_ref, logits_ref, nll_ref,
                  *, tile_bt, vpad, bt):
    """One row tile: gather embedding rows + fused cross-entropy."""
    base = pl.program_id(0) * tile_bt

    # Embedding lookup: token ids live in SMEM (scalar prefetch); gather the
    # matching rows straight out of the VMEM-resident table into the
    # lane-dense logits output tile.  tile_bt is small & static -> unrolled.
    for r in range(tile_bt):
        tok = idx_smem[base + r]
        logits_ref[pl.ds(r, 1), :] = table_ref[pl.ds(tok, 1), :]

    logits = logits_ref[...]                          # (tile_bt, vpad) f32
    tgt = tgt_ref[...]                                # (tile_bt, 1)   int32

    # Numerically stable log-sum-exp.  Pad lanes were pre-filled with -1e30 in
    # the wrapper, so no lane mask is needed here: exp(-1e30 - m) == 0.
    m = jnp.max(logits, axis=-1, keepdims=True)
    lse = jnp.log(jnp.sum(jnp.exp(logits - m), axis=-1, keepdims=True)) + m

    # Target logit via select + lane reduce (targets < vocab, so the -1e30
    # pad lanes are never selected).
    col = jax.lax.broadcasted_iota(jnp.int32, (tile_bt, vpad), 1)
    tgt_logit = jnp.sum(jnp.where(col == tgt, logits, 0.0),
                        axis=-1, keepdims=True)

    # Per-row NLL; zero padded rows so the wrapper can reduce blindly.
    row = base + jax.lax.broadcasted_iota(jnp.int32, (tile_bt, 1), 0)
    nll_ref[...] = jnp.where(row < bt, lse - tgt_logit, 0.0)


def bigram_forward(idx, targets, table, *, tile_bt=8):
    """Pallas equivalent of BigramLanguageModel.forward(idx, targets).

    idx:     (B, T) int token ids
    targets: (B, T) int token ids, or None
    table:   (V, V) float32 embedding table
    Returns (logits, loss): logits is (B*T, V) when targets is given (matching
    the PyTorch view), (B, T, V) with loss=None otherwise.
    """
    assert tile_bt % 8 == 0, "tile_bt must be a multiple of 8 (sublane tiling)"
    B, T = idx.shape
    V = table.shape[0]
    BT = B * T

    vpad = pl.cdiv(V, LANE) * LANE              # lane-dense vocab axis (65 -> 128)
    num_tiles = pl.cdiv(BT, tile_bt)
    bt_pad = num_tiles * tile_bt

    # Padded / flattened operands.  Padding rows use token 0 (valid row, NLL is
    # zeroed in-kernel); padded vocab lanes of the table carry -1e30 so the
    # kernel's softmax needs no lane mask.
    idx_flat = jnp.zeros((bt_pad,), jnp.int32).at[:BT].set(
        idx.reshape(-1).astype(jnp.int32))
    tgt_src = (jnp.zeros((BT,), jnp.int32) if targets is None
               else targets.reshape(-1).astype(jnp.int32))
    tgt_flat = jnp.zeros((bt_pad, 1), jnp.int32).at[:BT, 0].set(tgt_src)
    table_p = jnp.full((vpad, vpad), NEG, jnp.float32).at[:V, :V].set(
        table.astype(jnp.float32))

    kernel = functools.partial(bigram_kernel, tile_bt=tile_bt, vpad=vpad, bt=BT)

    grid_spec = pltpu.PrefetchScalarGridSpec(
        num_scalar_prefetch=1,                  # token ids -> SMEM
        grid=(num_tiles,),
        in_specs=[
            pl.BlockSpec((tile_bt, 1), lambda i, ids: (i, 0)),     # targets
            pl.BlockSpec((vpad, vpad), lambda i, ids: (0, 0)),     # table (resident)
        ],
        out_specs=[
            pl.BlockSpec((tile_bt, vpad), lambda i, ids: (i, 0)),  # logits, lane dense
            pl.BlockSpec((tile_bt, 1), lambda i, ids: (i, 0)),     # per-row NLL
        ],
    )

    logits_pad, nll = pl.pallas_call(
        kernel,
        grid_spec=grid_spec,
        out_shape=(
            jax.ShapeDtypeStruct((bt_pad, vpad), jnp.float32),
            jax.ShapeDtypeStruct((bt_pad, 1), jnp.float32),
        ),
        compiler_params=pltpu.CompilerParams(
            dimension_semantics=("parallel",),  # row tiles shard across v7x's 2 TCs
        ),
    )(idx_flat, tgt_flat, table_p)

    logits = logits_pad[:BT, :V]
    if targets is None:
        return logits.reshape(B, T, V), None
    loss = jnp.sum(nll) * (1.0 / BT)            # padded rows contribute 0
    return logits, loss


if __name__ == "__main__":
    key = jax.random.PRNGKey(0)
    k_tab, k_idx, k_tgt = jax.random.split(key, 3)

    vocab_size = 65   # e.g. tiny-shakespeare character vocab
    B, T = 2, 8

    # deterministic parameter init (nn.Embedding default: standard normal)
    table = jax.random.normal(k_tab, (vocab_size, vocab_size), dtype=jnp.float32)
    idx = jax.random.randint(k_idx, (B, T), 0, vocab_size, dtype=jnp.int32)
    targets = jax.random.randint(k_tgt, (B, T), 0, vocab_size, dtype=jnp.int32)

    logits, loss = bigram_forward(idx, targets, table)
    jax.block_until_ready((logits, loss))

    # sanity-check against a pure-JAX reference of the PyTorch forward
    ref_logits = table[idx.reshape(-1)]
    ref_lse = jax.nn.logsumexp(ref_logits, axis=-1)
    ref_loss = jnp.mean(ref_lse - ref_logits[jnp.arange(B * T),
                                             targets.reshape(-1)])
    assert logits.shape == (B * T, vocab_size)
    assert jnp.allclose(logits, ref_logits, atol=1e-5)
    assert jnp.allclose(loss, ref_loss, atol=1e-5)

    # also exercise the targets=None path (logits only, loss is None)
    logits_nt, loss_nt = bigram_forward(idx, None, table)
    jax.block_until_ready(logits_nt)
    assert loss_nt is None and logits_nt.shape == (B, T, vocab_size)
    assert jnp.allclose(logits_nt.reshape(B * T, vocab_size), ref_logits, atol=1e-5)

    # TODO(synk): generate() (autoregressive torch.multinomial sampling loop) is
    # host-side control flow outside the forward hot path; not a kernel.
    print("KERNEL_OK")
</pallas_src>

<mosaic_0001>
module attributes {stable_mosaic.version = 11 : i64} {
  func.func @bigram_kernel(%arg0: i32, %arg1: memref<16xi32, #tpu.memory_space<smem>>, %arg2: memref<8x1xi32, #tpu.memory_space<vmem>>, %arg3: memref<128x128xf32, #tpu.memory_space<vmem>>, %arg4: memref<8x128xf32, #tpu.memory_space<vmem>>, %arg5: memref<8x1xf32, #tpu.memory_space<vmem>>) attributes {dimension_semantics = [#tpu.dimension_semantics<parallel>], iteration_bounds = array<i64: 2>, scalar_prefetch = 1 : i64, scratch_operands = 0 : i64, tpu.core_type = #tpu.core_type<tc>, window_params = [{transform_indices = @transform_0, window_bounds = array<i64: 8, 1>}, {pipeline_mode = #tpu.pipeline_mode<synchronous>, transform_indices = @transform_1, window_bounds = array<i64: 128, 128>}, {transform_indices = @transform_2, window_bounds = array<i64: 8, 128>}, {transform_indices = @transform_3, window_bounds = array<i64: 8, 1>}]} {
    %c8_i32 = arith.constant 8 : i32
    %0 = arith.muli %arg0, %c8_i32 : i32
    %c0_i32 = arith.constant 0 : i32
    %1 = arith.addi %0, %c0_i32 : i32
    %2 = arith.index_cast %1 : i32 to index
    %3 = memref.load %arg1[%2] : memref<16xi32, #tpu.memory_space<smem>>
    %4 = arith.index_cast %3 : i32 to index
    %c0 = arith.constant 0 : index
    %5 = vector.load %arg3[%4, %c0] : memref<128x128xf32, #tpu.memory_space<vmem>>, vector<1x128xf32>
    %c0_0 = arith.constant 0 : index
    %c0_1 = arith.constant 0 : index
    %6 = vector.load %arg4[%c0_0, %c0_1] : memref<8x128xf32, #tpu.memory_space<vmem>>, vector<1x128xf32>
    tpu.vector_store %arg4[%c0_0, %c0_1], %5 {strides = array<i32>} : memref<8x128xf32, #tpu.memory_space<vmem>>, vector<1x128xf32>,
    %c1_i32 = arith.constant 1 : i32
    %7 = arith.addi %0, %c1_i32 : i32
    %8 = arith.index_cast %7 : i32 to index
    %9 = memref.load %arg1[%8] : memref<16xi32, #tpu.memory_space<smem>>
    %10 = arith.index_cast %9 : i32 to index
    %c0_2 = arith.constant 0 : index
    %11 = vector.load %arg3[%10, %c0_2] : memref<128x128xf32, #tpu.memory_space<vmem>>, vector<1x128xf32>
    %c1 = arith.constant 1 : index
    %c0_3 = arith.constant 0 : index
    %12 = vector.load %arg4[%c1, %c0_3] : memref<8x128xf32, #tpu.memory_space<vmem>>, vector<1x128xf32>
    tpu.vector_store %arg4[%c1, %c0_3], %11 {strides = array<i32>} : memref<8x128xf32, #tpu.memory_space<vmem>>, vector<1x128xf32>,
    %c2_i32 = arith.constant 2 : i32
    %13 = arith.addi %0, %c2_i32 : i32
    %14 = arith.index_cast %13 : i32 to index
    %15 = memref.load %arg1[%14] : memref<16xi32, #tpu.memory_space<smem>>
    %16 = arith.index_cast %15 : i32 to index
    %c0_4 = arith.constant 0 : index
    %17 = vector.load %arg3[%16, %c0_4] : memref<128x128xf32, #tpu.memory_space<vmem>>, vector<1x128xf32>
    %c2 = arith.constant 2 : index
    %c0_5 = arith.constant 0 : index
    %18 = vector.load %arg4[%c2, %c0_5] : memref<8x128xf32, #tpu.memory_space<vmem>>, vector<1x128xf32>
    tpu.vector_store %arg4[%c2, %c0_5], %17 {strides = array<i32>} : memref<8x128xf32, #tpu.memory_space<vmem>>, vector<1x128xf32>,
    %c3_i32 = arith.constant 3 : i32
    %19 = arith.addi %0, %c3_i32 : i32
    %20 = arith.index_cast %19 : i32 to index
    %21 = memref.load %arg1[%20] : memref<16xi32, #tpu.memory_space<smem>>
    %22 = arith.index_cast %21 : i32 to index
    %c0_6 = arith.constant 0 : index
    %23 = vector.load %arg3[%22, %c0_6] : memref<128x128xf32, #tpu.memory_space<vmem>>, vector<1x128xf32>
    %c3 = arith.constant 3 : index
    %c0_7 = arith.constant 0 : index
    %24 = vector.load %arg4[%c3, %c0_7] : memref<8x128xf32, #tpu.memory_space<vmem>>, vector<1x128xf32>
    tpu.vector_store %arg4[%c3, %c0_7], %23 {strides = array<i32>} : memref<8x128xf32, #tpu.memory_space<vmem>>, vector<1x128xf32>,
    %c4_i32 = arith.constant 4 : i32
    %25 = arith.addi %0, %c4_i32 : i32
    %26 = arith.index_cast %25 : i32 to index
    %27 = memref.load %arg1[%26] : memref<16xi32, #tpu.memory_space<smem>>
    %28 = arith.index_cast %27 : i32 to index
    %c0_8 = arith.constant 0 : index
    %29 = vector.load %arg3[%28, %c0_8] : memref<128x128xf32, #tpu.memory_space<vmem>>, vector<1x128xf32>
    %c4 = arith.constant 4 : index
    %c0_9 = arith.constant 0 : index
    %30 = vector.load %arg4[%c4, %c0_9] : memref<8x128xf32, #tpu.memory_space<vmem>>, vector<1x128xf32>
    tpu.vector_store %arg4[%c4, %c0_9], %29 {strides = array<i32>} : memref<8x128xf32, #tpu.memory_space<vmem>>, vector<1x128xf32>,
    %c5_i32 = arith.constant 5 : i32
    %31 = arith.addi %0, %c5_i32 : i32
    %32 = arith.index_cast %31 : i32 to index
    %33 = memref.load %arg1[%32] : memref<16xi32, #tpu.memory_space<smem>>
    %34 = arith.index_cast %33 : i32 to index
    %c0_10 = arith.constant 0 : index
    %35 = vector.load %arg3[%34, %c0_10] : memref<128x128xf32, #tpu.memory_space<vmem>>, vector<1x128xf32>
    %c5 = arith.constant 5 : index
    %c0_11 = arith.constant 0 : index
    %36 = vector.load %arg4[%c5, %c0_11] : memref<8x128xf32, #tpu.memory_space<vmem>>, vector<1x128xf32>
    tpu.vector_store %arg4[%c5, %c0_11], %35 {strides = array<i32>} : memref<8x128xf32, #tpu.memory_space<vmem>>, vector<1x128xf32>,
    %c6_i32 = arith.constant 6 : i32
    %37 = arith.addi %0, %c6_i32 : i32
    %38 = arith.index_cast %37 : i32 to index
    %39 = memref.load %arg1[%38] : memref<16xi32, #tpu.memory_space<smem>>
    %40 = arith.index_cast %39 : i32 to index
    %c0_12 = arith.constant 0 : index
    %41 = vector.load %arg3[%40, %c0_12] : memref<128x128xf32, #tpu.memory_space<vmem>>, vector<1x128xf32>
    %c6 = arith.constant 6 : index
    %c0_13 = arith.constant 0 : index
    %42 = vector.load %arg4[%c6, %c0_13] : memref<8x128xf32, #tpu.memory_space<vmem>>, vector<1x128xf32>
    tpu.vector_store %arg4[%c6, %c0_13], %41 {strides = array<i32>} : memref<8x128xf32, #tpu.memory_space<vmem>>, vector<1x128xf32>,
    %c7_i32 = arith.constant 7 : i32
    %43 = arith.addi %0, %c7_i32 : i32
    %44 = arith.index_cast %43 : i32 to index
    %45 = memref.load %arg1[%44] : memref<16xi32, #tpu.memory_space<smem>>
    %46 = arith.index_cast %45 : i32 to index
    %c0_14 = arith.constant 0 : index
    %47 = vector.load %arg3[%46, %c0_14] : memref<128x128xf32, #tpu.memory_space<vmem>>, vector<1x128xf32>
    %c7 = arith.constant 7 : index
    %c0_15 = arith.constant 0 : index
    %48 = vector.load %arg4[%c7, %c0_15] : memref<8x128xf32, #tpu.memory_space<vmem>>, vector<1x128xf32>
    tpu.vector_store %arg4[%c7, %c0_15], %47 {strides = array<i32>} : memref<8x128xf32, #tpu.memory_space<vmem>>, vector<1x128xf32>,
    %c0_16 = arith.constant 0 : index
    %c0_17 = arith.constant 0 : index
    %49 = vector.load %arg4[%c0_16, %c0_17] : memref<8x128xf32, #tpu.memory_space<vmem>>, vector<8x128xf32>
    %c0_18 = arith.constant 0 : index
    %c0_19 = arith.constant 0 : index
    %50 = vector.load %arg2[%c0_18, %c0_19] : memref<8x1xi32, #tpu.memory_space<vmem>>, vector<8x1xi32>
    %cst = arith.constant dense<0xFF800000> : vector<8xf32>
    %51 = vector.multi_reduction <maximumf>, %49, %cst [1] : vector<8x128xf32> to vector<8xf32>
    %52 = vector.shape_cast %51 : vector<8xf32> to vector<8x1xf32>
    %53 = vector.broadcast %52 : vector<8x1xf32> to vector<8x128xf32>
    %54 = arith.subf %49, %53 : vector<8x128xf32>
    %55 = math.exp %54 : vector<8x128xf32>
    %cst_20 = arith.constant dense<0.000000e+00> : vector<8xf32>
    %56 = vector.multi_reduction <add>, %55, %cst_20 [1] : vector<8x128xf32> to vector<8xf32>
    %57 = vector.shape_cast %56 : vector<8xf32> to vector<8x1xf32>
    %58 = math.log %57 : vector<8x1xf32>
    %59 = arith.addf %58, %52 : vector<8x1xf32>
    %60 = tpu.iota {dimensions = array<i32: 1>} : vector<8x128xi32>
    %61 = vector.broadcast %50 : vector<8x1xi32> to vector<8x128xi32>
    %62 = arith.cmpi eq, %60, %61 : vector<8x128xi32>
    %cst_21 = arith.constant 0.000000e+00 : f32
    %63 = vector.broadcast %cst_21 : f32 to vector<8x128xf32>
    %64 = arith.select %62, %49, %63 : vector<8x128xi1>, vector<8x128xf32>
    %cst_22 = arith.constant dense<0.000000e+00> : vector<8xf32>
    %65 = vector.multi_reduction <add>, %64, %cst_22 [1] : vector<8x128xf32> to vector<8xf32>
    %66 = vector.shape_cast %65 : vector<8xf32> to vector<8x1xf32>
    %67 = tpu.iota {dimensions = array<i32: 0>} : vector<8x1xi32>
    %68 = vector.broadcast %0 : i32 to vector<8x1xi32>
    %69 = arith.addi %68, %67 : vector<8x1xi32>
    %c16_i32 = arith.constant 16 : i32
    %70 = vector.broadcast %c16_i32 : i32 to vector<8x1xi32>
    %71 = arith.cmpi slt, %69, %70 : vector<8x1xi32>
    %72 = arith.subf %59, %66 : vector<8x1xf32>
    %cst_23 = arith.constant 0.000000e+00 : f32
    %73 = vector.broadcast %cst_23 : f32 to vector<8x1xf32>
    %74 = arith.select %71, %72, %73 : vector<8x1xi1>, vector<8x1xf32>
    %c0_24 = arith.constant 0 : index
    %c0_25 = arith.constant 0 : index
    %75 = vector.load %arg5[%c0_24, %c0_25] : memref<8x1xf32, #tpu.memory_space<vmem>>, vector<8x1xf32>
    tpu.vector_store %arg5[%c0_24, %c0_25], %74 {strides = array<i32>} : memref<8x1xf32, #tpu.memory_space<vmem>>, vector<8x1xf32>,
    return
  }
  func.func @transform_0(%arg0: i32, %arg1: memref<16xi32, #tpu.memory_space<smem>>) -> (i32, i32) {
    %c0_i32 = arith.constant 0 : i32
    %c0_i32_0 = arith.constant 0 : i32
    return %arg0, %c0_i32 : i32, i32
  }
  func.func @transform_1(%arg0: i32, %arg1: memref<16xi32, #tpu.memory_space<smem>>) -> (i32, i32) {
    %c0_i32 = arith.constant 0 : i32
    %c0_i32_0 = arith.constant 0 : i32
    %c0_i32_1 = arith.constant 0 : i32
    return %c0_i32, %c0_i32_0 : i32, i32
  }
  func.func @transform_2(%arg0: i32, %arg1: memref<16xi32, #tpu.memory_space<smem>>) -> (i32, i32) {
    %c0_i32 = arith.constant 0 : i32
    %c0_i32_0 = arith.constant 0 : i32
    return %arg0, %c0_i32 : i32, i32
  }
  func.func @transform_3(%arg0: i32, %arg1: memref<16xi32, #tpu.memory_space<smem>>) -> (i32, i32) {
    %c0_i32 = arith.constant 0 : i32
    %c0_i32_0 = arith.constant 0 : i32
    return %arg0, %c0_i32 : i32, i32
  }
}

</mosaic_0001>

<bundles_post_ra>
// kernel: tpu_custom_call.1
= control target key start
LH: loop header
LB: loop body
LE: loop exit
PB: predicated region body
PF: predicated region fallthrough
CT: control target
= control target key end

     0   :  { %s584_s18 = smov [#allocation3]   ;;  %s750_s0 = inlined_call_operand.vmem [shape: s32[16], index: 0, kind: input, shape index: {}]   ;;  %s751_s1 = inlined_call_operand.vmem [shape: s32[16,1], index: 1, kind: input, shape index: {}]   ;;  %s752_s2 = inlined_call_operand.hbm [shape: f32[128,128], index: 2, kind: input, shape index: {}]   ;;  %s753_s3 = inlined_call_operand.hbm [shape: f32[16,128], index: 3, kind: output, shape index: {0}]   ;;  %s754_s4 = inlined_call_operand.vmem [shape: f32[16,1], index: 4, kind: output, shape index: {1}]  }
   0x1   :  { %s11_s17 = sshll.u32 %s750_s0, 4  ;;  %s12_s17 = int_to_ptr.vmem [resolvable:$true] %s11_s17 }
   0x2   :  { %14 = dma.vmem_to_smem %s12_s17, 16, %s584_s18, [#allocation2] }
   0x3   :  { %558 = dma.done.wait [#allocation2], 16 }
   0x4   :  { %559 = vsyncadd [#allocation2], 4294967280 }
   0x5   :  { %17 = sfence }
   0x6   :  { %18 = vsyncpa [#allocation5], 0 }
   0x7   :  { %19 = vsyncpa [#allocation6], 0 }
   0x8   :  { %21 = vsyncpa [#allocation6 + $0x1], 0  ;;  %s617_s19 = smov 0   ;;  %s619_s20 = smov 0  }
   0x9   :  { %s621_s21 = smov 0   ;;  %s623_s22 = smov 0  }
   0xa LB: > { %s638_s0 = sadd.s32 4294967295, %s582_s22   ;;  %s399_s23 = sadd.s32 4294967294, %s582_s22   ;;  %s582_s22 = sphi %s623_s22, %s760_s22   ;;  %s578_s21 = sphi %s621_s21, %s759_s21   ;;  %s574_s20 = sphi %s619_s20, %s758_s20   ;;  %s570_s19 = sphi %s617_s19, %s757_s19  }
   0xb   : > { %s642_s24 = sadd.s32 1, %s582_s22   ;;  %s81_s25 = sadd.s32 1, %s578_s21 }
   0xc   : > { %s78_s26 = ssub.s32 %s582_s22, %s642_s24  ;;  %p91_p0 = scmp.ne.s32.totalorder %s578_s21, %s574_s20 }
   0xd   : > { %p79_p1 = scmp.eq.s32.totalorder %s78_s26, 0  ;;  %p92_p2 = scmp.eq.s32.totalorder %s638_s0, 1 }
   0xe   : > { %p97_p3 = scmp.ne.s32.totalorder %s574_s20, %s570_s19  ;;  %p98_p4 = scmp.eq.s32.totalorder %s399_s23, 1 }
   0xf   : > { %s653_s27 = scalar_select %p79_p1, %s578_s21, %s81_s25  }
  0x10   : > { %p655_p5 = por %p92_p2, %p91_p0  ;;  %p659_p6 = por %p98_p4, %p97_p3 }
  0x11   : > { %p400_p7 = scmp.ge.s32.totalorder %s582_s22, 1  ;;  %p131_p8 = scmp.lt.s32.totalorder %s582_s22, 3 }
  0x12   : > { %p427_p9 = scmp.eq.s32.totalorder %s638_s0, 0  ;;  %s142_s6 = sshll.u32 %s752_s2, 4  ;;  %s143_s6 = int_to_ptr.hbm [resolvable:$true] %s142_s6 }
  0x13   : > { %p132_p10 = pnand %p400_p7, %p131_p8  ;;  %s585_s7 = smov [#allocation4]  }
  0x14   : > { %s144_s8 = sshll.u32 %s585_s7, 4  ;;  %s586_s9 = smov 128   ;;  %s145_s8 = int_to_ptr.vmem [resolvable:$true] %s144_s8 }
  0x15   : > { %p419_p11 = pneg %p132_p10  ;;  %s587_s10 = smov 8  }
  0x16   : > { %167 = sbr.rel (%p132_p10) target bundleno = 312 (0x138), region = 28 }
  0x17   : > { %p420_p12 = pnand %p427_p9, %p419_p11 }
  0x19   : > { %422 = dma.hbm_to_vmem [thread:$0]  (!%p420_p12), %s143_s6, 2048, %s145_s8, [#allocation5], %s586_s9, %s586_s9, %s587_s10  }
  0x1b   : > { %561 = dma.done.wait (%p427_p9), [#allocation5], 2048  }
  0x1c   : > { %563 = vsyncadd (%p427_p9), [#allocation5], 4294965248  ;;  %s186_s11 = sand.u32 1, %s574_s20   ;;  %s677_s12 = sshll.u32 %s638_s0, 3  ;;  %v588_v0 = vmov 0   ;;  %v255_v15 = vlaneseq }
  0x1d   : > { %s405_s13 = sshll.u32 %s186_s11, 3  ;;  %s204_s14 = sld [smem:[#allocation3 + %s677_s12]]  ;;  %467 = vset.pattern.permute.xlu0 %v588_v0 }
  0x1e   : > { %s208_s15 = sadd.s32 1, %s677_s12  ;;  %s213_s17 = sadd.s32 2, %s677_s12 }
  0x1f   : > { %s209_s16 = sld [smem:[#allocation3 + %s208_s15]]  ;;  %s218_s23 = sadd.s32 3, %s677_s12 }
  0x20   : > { %s214_s18 = sld [smem:[#allocation3 + %s213_s17]]  ;;  %s223_s26 = sadd.s32 4, %s677_s12 }
  0x21   : > { %s219_s25 = sld [smem:[#allocation3 + %s218_s23]]  ;;  %s228_s5 = sadd.s32 5, %s677_s12 }
  0x22   : > { %s224_s30 = sld [smem:[#allocation3 + %s223_s26]]  ;;  %s233_s8 = sadd.s32 6, %s677_s12 }
  0x23   : > { %s229_s6 = sld [smem:[#allocation3 + %s228_s5]]  ;;  %s205_s7 = scalar_lea.vmem [#allocation4], %s204_s14 }
  0x24   : > { %v206_v1 = vld [vmem:[%s205_s7] sm:$0x1]  ;;  %s238_s9 = sadd.s32 7, %s677_s12  ;;  %s689_s10 = scalar_lea.vmem [#allocation7], %s405_s13 }
  0x25   : > { %207 = vst [vmem:[%s689_s10] sm:$0x1] %v206_v1  ;;  %s234_s15 = sld [smem:[#allocation3 + %s233_s8]]  ;;  %s210_s17 = scalar_lea.vmem [#allocation4], %s209_s16 }
  0x26   : > { %v211_v2 = vld [vmem:[%s210_s17] sm:$0x1]  ;;  %s239_s23 = sld [smem:[#allocation3 + %s238_s9]]  ;;  %s215_s26 = scalar_lea.vmem [#allocation4], %s214_s18 }
  0x27   : > { %212 = vst [vmem:[%s689_s10 + $0x1] sm:$0x1] %v211_v2  ;;  %v216_v3 = vld [vmem:[%s215_s26] sm:$0x1]  ;;  %s220_s13 = scalar_lea.vmem [#allocation4], %s219_s25  ;;  %p195_p13 = scmp.lt.s32.totalorder %s638_s0, 1 }
  0x28   : > { %217 = vst [vmem:[%s689_s10 + $0x2] sm:$0x1] %v216_v3  ;;  %v221_v4 = vld [vmem:[%s220_s13] sm:$0x1]  ;;  %s225_s14 = scalar_lea.vmem [#allocation4], %s224_s30  ;;  %s290_s17 = sshll.u32 %s689_s10, 4  ;;  %s291_s17 = int_to_ptr.vmem [resolvable:$true] %s290_s17 }
  0x29   : > { %222 = vst [vmem:[%s689_s10 + $0x3] sm:$0x1] %v221_v4  ;;  %v226_v5 = vld [vmem:[%s225_s14] sm:$0x1]  ;;  %s230_s5 = scalar_lea.vmem [#allocation4], %s229_s6  ;;  %s762_s0 = smov (!%p195_p13, %s638_s0), 1 }
  0x2a   : > { %227 = vst [vmem:[%s689_s10 + $0x4] sm:$0x1] %v226_v5  ;;  %v231_v6 = vld [vmem:[%s230_s5] sm:$0x1]  ;;  %s406_s18 = sshll.u32 %s762_s0, 3  ;;  %s274_s26 = scalar_lea.sflag [#allocation6], %s186_s11 }
  0x2b   : > { %232 = vst [vmem:[%s689_s10 + $0x5] sm:$0x1] %v231_v6  ;;  %s235_s16 = scalar_lea.vmem [#allocation4], %s234_s15  ;;  %s198_s6 = scalar_lea.vmem %s751_s1, %s406_s18 }
  0x2c   : > { %v236_v7 = vld [vmem:[%s235_s16] sm:$0x1]  ;;  %s240_s7 = scalar_lea.vmem [#allocation4], %s239_s23  ;;  %s288_s15 = scalar_lea.hbm %s753_s3, %s677_s12 }
  0x2d   : > { %237 = vst [vmem:[%s689_s10 + $0x6] sm:$0x1] %v236_v7  ;;  %v241_v8 = vld [vmem:[%s240_s7] sm:$0x1]  ;;  %s292_s23 = sshll.u32 %s288_s15, 4  ;;  %s534_s7 = scalar_lea.hbm %s753_s3, 16  ;;  %s293_s23 = int_to_ptr.hbm [resolvable:$true] %s292_s23 }
  0x2e   : > { %242 = vst [vmem:[%s689_s10 + $0x7] sm:$0x1] %v241_v8  ;;  %v244_v10 = vld [vmem:[%s198_s6] sm:$0xff]  ;;  %s528_s13 = sshra.s32 %s293_s23, 4  ;;  %s529_s13 = int_to_ptr.hbm [resolvable:$true] %s528_s13 }
  0x2f   : > { %s530_s14 = scalar_lea.hbm %s529_s13, 8  ;;  %p535_p3 = scmp.lt.s32.totalorder %s529_s13, %s753_s3 }
  0x30   : > { %p531_p0 = scmp.ne.s32.totalorder %s529_s13, %s530_s14  ;;  %p536_p4 = scmp.lt.s32.totalorder %s534_s7, %s530_s14 }
  0x32   : > { %p532_p1 = pnand %p531_p0, %p655_p5  ;;  %p537_p7 = por %p536_p4, %p535_p3 }
  0x34   : > { %p533_p2 = pneg %p532_p1 }
  0x35   : > { %v243_v9 = vld [vmem:[%s689_s10] sm:$0xff] }
  0x36   : > { %245 = vmax.xlane.f32.xlu0 %v243_v9  ;;  %p538_p8 = pnand %p537_p7, %p533_p2 }
  0x4a   : > { %258 = vperm.xlu0 %467, %v244_v10  }
  0xa9   : > { %v246_v11 = vpop.xlane.xlu0 %245 }
  0xaa   : > { %v247_v12 = vsub.f32 %v243_v9, %v246_v11 }
  0xac   : > { %v248_v13 = vmul.f32 1.442695, %v247_v12 }
  0xae   : > { %468 = vpow2.f32 %v248_v13 }
  0xb4   : > { %v469_v14 = vpop.eup %468 }
  0xb5   : > { %250 = vadd.xlane.f32.xlu1 %v469_v14 }
  0xb6   : > { %541 = shalt.err (!%p538_p8)
}
  0xb7   : > { %417 = dma.vmem_to_hbm [thread:$0]  (%p655_p5), %s291_s17, 128, %s293_s23, %s274_s26   ;;  %v256_v16 = vand.u32 127, %v255_v15  ;;  %v265_v20 = vshrl.u32 %v255_v15, 7  ;;  %v266_v21 = vstv %s677_s12  ;;  %vm271_vm2 = vcmask 7168  }
  0xb8   : > { %s202_s10 = scalar_lea.vmem %s754_s4, %s406_s18 }
  0xb9   : > { %v267_v23 = vadd.s32 %v266_v21, %v265_v20 }
  0xbb   : > { %vm268_vm1 = vcmp.lt.s32.totalorder %v267_v23, 16 }
  0xbc   : > { %v259_v17 = vpop.permute.xlu0 %258 }
  0xbd   : > { %vm260_vm0 = vcmp.eq.s32.totalorder %v256_v16, %v259_v17 }
  0xbe   : > { %v261_v18 = vsel %vm260_vm0, %v243_v9, 0.0 }
  0xbf   : > { %262 = vadd.xlane.f32.xlu1 %v261_v18 }
 0x128   : > { %v251_v19 = vpop.xlane.xlu1 %250 }
 0x129   : > { %470 = vlog2.f32 %v251_v19 }
 0x12f   : > { %v471_v22 = vpop.eup %470 }
 0x130   : > { %v253_v24 = vmul.f32 0.6931472, %v471_v22 }
 0x132   : > { %v254_v25 = vadd.f32 %v253_v24, %v246_v11  ;;  %v263_v26 = vpop.xlane.xlu1 %262 }
 0x134   : > { %v269_v27 = vsub.f32 %v254_v25, %v263_v26 }
 0x136   : > { %v270_v28 = vsel %vm268_vm1, %v269_v27, 0.0 }
 0x137   : > { %272 = vst.msk [vmem:[%s202_s10] sm:$0xff] %vm271_vm2, %v270_v28 }
 0x138 PF: > { %p429_p5 = scmp.ge.s32.totalorder %s582_s22, 2  ;;  %s307_s12 = sand.u32 1, %s570_s19  }
 0x139   : > { %s308_s6 = scalar_lea.sflag [#allocation6], %s307_s12 }
 0x13a   : > { %p424_p9 = pnand %p429_p5, %p659_p6 }
 0x13c   : > { %p425_p10 = pneg %p424_p9 }
 0x13e   : > { %565 = dma.done.wait (%p425_p10), %s308_s6, 128  }
 0x13f   : > { %567 = vsyncadd (%p425_p10), %s308_s6, 4294967168  ;;  %p24_p11 = scmp.ge.s32.totalorder %s642_s24, 4   ;;  %s757_s19 = smov %s574_s20 }
 0x140   : > { %s758_s20 = smov %s578_s21  ;;  %s759_s21 = smov %s653_s27 }
 0x141   : > { %s760_s22 = smov %s642_s24  ;;  %26 = sbr.rel (!%p24_p11) target bundleno = 10 (0xa), region = 88 }
 0x146   :  { %321 = vsyncpa [#allocation5], 1 }
 0x147   :  { %323 = vsyncpa [#allocation5 + $0x1], 1 }
 0x148   :  { %324 = vsyncpa [#allocation6], 1 }
 0x149   :  { %326 = vsyncpa [#allocation6 + $0x1], 1 }

</bundles_post_ra>
